<compile_context>
chip_gen: v7x
topology: tpu7x:2x2x1
jax: 0.10.0
libtpu: 0.0.40
codegen_flags: <defaults>
</compile_context>

<pallas_src>
import numpy as np
import jax
import jax.numpy as jnp
from jax.experimental import pallas as pl
from jax.experimental.pallas import tpu as pltpu

SUBLANE = 8          # vreg sublane count
MAX_TILE = 1024      # max batch rows per grid step (perf review: 512-1024)
SINGLE_TILE_MAX = 256  # below this, one tile; op is launch-overhead bound anyway


def _cdiv(a, b):
    return -(-a // b)


def _round_up(n, m):
    return ((n + m - 1) // m) * m


def _batch_tile(B):
    """Pick (tile_rows, n_tiles) for the batch axis.

    * B <= SINGLE_TILE_MAX: one full-batch tile (block dim == array dim, legal).
    * Larger B: >= 2 tiles so the "parallel" axis shards across both v7x
      TensorCores, each tile a multiple of 8 rows and capped at MAX_TILE rows.
    """
    if B <= SINGLE_TILE_MAX:
        return B, 1
    tb = min(MAX_TILE, _round_up(_cdiv(B, 2), SUBLANE))
    return tb, _cdiv(B, tb)


# ----------------------------------------------------------------------------
# Kernels
# ----------------------------------------------------------------------------
def _noise_kernel(x_ref, n0_ref, n1_ref, n2_ref, w_ref, v_ref, out_ref):
    # v_ref rows: 0=nw0, 1=b1, 2=nw1, 3=b2, 4=nw2 (rest zero padding).
    nw0 = v_ref[0:1, :]
    b1 = v_ref[1:2, :]
    nw1 = v_ref[2:3, :]
    b2 = v_ref[3:4, :]
    nw2 = v_ref[4:5, :]
    out = x_ref[...] + nw0 * n0_ref[...]
    out = jnp.dot(out, w_ref[0], preferred_element_type=jnp.float32) + b1
    out = jnp.tanh(out + nw1 * n1_ref[...])
    out = jnp.dot(out, w_ref[1], preferred_element_type=jnp.float32) + b2
    out_ref[...] = jnp.tanh(out + nw2 * n2_ref[...]).astype(out_ref.dtype)


def _plain_kernel(x_ref, w_ref, v_ref, out_ref):
    b1 = v_ref[0:1, :]
    b2 = v_ref[1:2, :]
    h = jnp.tanh(jnp.dot(x_ref[...], w_ref[0], preferred_element_type=jnp.float32) + b1)
    out_ref[...] = jnp.tanh(jnp.dot(h, w_ref[1], preferred_element_type=jnp.float32)
                            + b2).astype(out_ref.dtype)


# ----------------------------------------------------------------------------
# Host-side parameter packing (done once at init; layout plumbing only)
# ----------------------------------------------------------------------------
def _pack_rows(rows, F):
    rows = [jnp.asarray(r, jnp.float32).reshape(-1) for r in rows]
    rows += [jnp.zeros((F,), jnp.float32)] * (SUBLANE - len(rows))
    return jnp.stack(rows)


def pack_noise_params(params):
    """(nw0, w1, b1, nw1, w2, b2, nw2) -> (w_packed (2,F,F), v_packed (8,F))."""
    nw0, w1, b1, nw1, w2, b2, nw2 = params
    w1 = jnp.asarray(w1, jnp.float32)
    w2 = jnp.asarray(w2, jnp.float32)
    F = w1.shape[0]
    # PyTorch Linear weight is (F_out, F_in); pre-transpose so kernel does x @ W.
    w_packed = jnp.stack([w1.T, w2.T])
    return w_packed, _pack_rows([nw0, b1, nw1, b2, nw2], F)


def pack_plain_params(params):
    """(w1, b1, w2, b2) -> (w_packed (2,F,F), v_packed (8,F))."""
    w1, b1, w2, b2 = params
    w1 = jnp.asarray(w1, jnp.float32)
    w2 = jnp.asarray(w2, jnp.float32)
    F = w1.shape[0]
    w_packed = jnp.stack([w1.T, w2.T])
    return w_packed, _pack_rows([b1, b2], F)


def _cost(B, F, n_row_streams):
    return pl.CostEstimate(
        flops=2 * 2 * B * F * F,                  # two matmuls
        transcendentals=2 * B * F,                # two tanh layers
        bytes_accessed=(n_row_streams * B * F + 2 * F * F + SUBLANE * F) * 4,
    )


# ----------------------------------------------------------------------------
# Wrappers
# ----------------------------------------------------------------------------
def meta_controller_noise(x, packed_params, noise=None, key=None):
    """add_noise=True path.  `noise`: optional tuple of 3 (B, F) arrays; if None,
    three standard-normal tensors are drawn host-side (== torch.randn_like)."""
    x = jnp.asarray(x, jnp.float32)
    B, F = x.shape
    w_packed, v_packed = packed_params

    if noise is None:
        if key is None:
            key = jax.random.PRNGKey(0)
        n0, n1, n2 = jax.random.normal(key, (3, B, F), jnp.float32)
    else:
        n0, n1, n2 = (jnp.asarray(z, jnp.float32) for z in noise)

    TB, n_tiles = _batch_tile(B)
    row_spec = pl.BlockSpec((TB, F), lambda i: (i, 0))

    return pl.pallas_call(
        _noise_kernel,
        out_shape=jax.ShapeDtypeStruct((B, F), jnp.float32),
        grid=(n_tiles,),
        in_specs=[row_spec, row_spec, row_spec, row_spec,
                  pl.BlockSpec((2, F, F), lambda i: (0, 0, 0)),   # resident weights
                  pl.BlockSpec((SUBLANE, F), lambda i: (0, 0))],  # resident vectors
        out_specs=row_spec,
        compiler_params=pltpu.CompilerParams(dimension_semantics=("parallel",)),
        cost_estimate=_cost(B, F, n_row_streams=5),
    )(x, n0, n1, n2, w_packed, v_packed)


def meta_controller_plain(x, packed_params):
    """add_noise=False path: Sequential(Linear, Tanh, Linear, Tanh)."""
    x = jnp.asarray(x, jnp.float32)
    B, F = x.shape
    w_packed, v_packed = packed_params

    TB, n_tiles = _batch_tile(B)
    row_spec = pl.BlockSpec((TB, F), lambda i: (i, 0))

    return pl.pallas_call(
        _plain_kernel,
        out_shape=jax.ShapeDtypeStruct((B, F), jnp.float32),
        grid=(n_tiles,),
        in_specs=[row_spec,
                  pl.BlockSpec((2, F, F), lambda i: (0, 0, 0)),
                  pl.BlockSpec((SUBLANE, F), lambda i: (0, 0))],
        out_specs=row_spec,
        compiler_params=pltpu.CompilerParams(dimension_semantics=("parallel",)),
        cost_estimate=_cost(B, F, n_row_streams=2),
    )(x, w_packed, v_packed)


# ----------------------------------------------------------------------------
# Pure-JAX references (for verification)
# ----------------------------------------------------------------------------
def ref_noise(x, noise, params):
    nw0, w1, b1, nw1, w2, b2, nw2 = params
    out = x + nw0 * noise[0]
    out = out @ w1.T + b1
    out = jnp.tanh(out + nw1 * noise[1])
    out = out @ w2.T + b2
    return jnp.tanh(out + nw2 * noise[2])


def ref_plain(x, params):
    w1, b1, w2, b2 = params
    h = jnp.tanh(x @ w1.T + b1)
    return jnp.tanh(h @ w2.T + b2)


# ----------------------------------------------------------------------------
# Deterministic parameter construction (mirrors module __init__)
# ----------------------------------------------------------------------------
def make_params(key, F, noise_weight_scale=0.0):
    k1, k2, k3, k4, k5 = jax.random.split(key, 5)
    ortho = jax.nn.initializers.orthogonal(scale=np.sqrt(2.0))
    w1 = ortho(k1, (F, F), jnp.float32)     # nn.Linear weight (out, in), gain sqrt(2)
    w2 = ortho(k2, (F, F), jnp.float32)
    b1 = jnp.zeros((F,), jnp.float32)
    b2 = jnp.zeros((F,), jnp.float32)
    # NoiseInjection weights are zeros at init; scale>0 exercises the nonzero path.
    nw0 = noise_weight_scale * jax.random.normal(k3, (F,), jnp.float32)
    nw1 = noise_weight_scale * jax.random.normal(k4, (F,), jnp.float32)
    nw2 = noise_weight_scale * jax.random.normal(k5, (F,), jnp.float32)
    return (nw0, w1, b1, nw1, w2, b2, nw2), (w1, b1, w2, b2)


# ----------------------------------------------------------------------------
if __name__ == "__main__":
    F = 32
    key = jax.random.PRNGKey(0)
    kx, kn, kp, kr = jax.random.split(key, 4)

    noise_params, plain_params = make_params(kp, F, noise_weight_scale=0.5)
    packed_noise = pack_noise_params(noise_params)
    packed_plain = pack_plain_params(plain_params)

    # Small single-tile cases plus a multi-tile case (exercises grid > 1).
    for B in (2, 8, 320):
        kb = jax.random.fold_in(kx, B)
        x = jax.random.normal(kb, (B, F), jnp.float32)
        kn0, kn1, kn2 = jax.random.split(jax.random.fold_in(kn, B), 3)
        noise = (jax.random.normal(kn0, (B, F), jnp.float32),
                 jax.random.normal(kn1, (B, F), jnp.float32),
                 jax.random.normal(kn2, (B, F), jnp.float32))

        # add_noise=True, explicit noise (matches PyTorch forward(inputs, noise)).
        out = jax.block_until_ready(meta_controller_noise(x, packed_noise, noise=noise))
        np.testing.assert_allclose(np.asarray(out),
                                   np.asarray(ref_noise(x, noise, noise_params)),
                                   rtol=1e-5, atol=1e-5)

        # add_noise=False path.
        out_p = jax.block_until_ready(meta_controller_plain(x, packed_plain))
        np.testing.assert_allclose(np.asarray(out_p),
                                   np.asarray(ref_plain(x, plain_params)),
                                   rtol=1e-5, atol=1e-5)

    # noise=None path with nonzero noise weights: host-drawn N(0,1), same kernel.
    x = jax.random.normal(kx, (8, F), jnp.float32)
    out_rng = jax.block_until_ready(
        meta_controller_noise(x, packed_noise, noise=None, key=kr))
    assert out_rng.shape == (8, F) and bool(jnp.all(jnp.isfinite(out_rng)))

    # noise=None path with the module's default init (NoiseInjection weights == 0):
    # the injected noise cancels exactly, so it must match the noiseless reference.
    init_noise_params, _ = make_params(kp, F, noise_weight_scale=0.0)
    packed_init = pack_noise_params(init_noise_params)
    out_init = jax.block_until_ready(
        meta_controller_noise(x, packed_init, noise=None, key=kr))
    np.testing.assert_allclose(np.asarray(out_init),
                               np.asarray(ref_plain(x, plain_params)),
                               rtol=1e-5, atol=1e-5)

    print("KERNEL_OK")
</pallas_src>

<mosaic_0001>
module attributes {stable_mosaic.version = 11 : i64} {
  func.func @_noise_kernel(%arg0: i32, %arg1: memref<2x32xf32, #tpu.memory_space<vmem>>, %arg2: memref<2x32xf32, #tpu.memory_space<vmem>>, %arg3: memref<2x32xf32, #tpu.memory_space<vmem>>, %arg4: memref<2x32xf32, #tpu.memory_space<vmem>>, %arg5: memref<2x32x32xf32, #tpu.memory_space<vmem>>, %arg6: memref<8x32xf32, #tpu.memory_space<vmem>>, %arg7: memref<2x32xf32, #tpu.memory_space<vmem>>) attributes {dimension_semantics = [#tpu.dimension_semantics<parallel>], iteration_bounds = array<i64: 1>, scalar_prefetch = 0 : i64, scratch_operands = 0 : i64, tpu.core_type = #tpu.core_type<tc>, window_params = [{transform_indices = @transform_0, window_bounds = array<i64: 2, 32>}, {transform_indices = @transform_1, window_bounds = array<i64: 2, 32>}, {transform_indices = @transform_2, window_bounds = array<i64: 2, 32>}, {transform_indices = @transform_3, window_bounds = array<i64: 2, 32>}, {pipeline_mode = #tpu.pipeline_mode<synchronous>, transform_indices = @transform_4, window_bounds = array<i64: 2, 32, 32>}, {pipeline_mode = #tpu.pipeline_mode<synchronous>, transform_indices = @transform_5, window_bounds = array<i64: 8, 32>}, {transform_indices = @transform_6, window_bounds = array<i64: 2, 32>}]} {
    %c0 = arith.constant 0 : index
    %c0_0 = arith.constant 0 : index
    %0 = vector.load %arg6[%c0, %c0_0] : memref<8x32xf32, #tpu.memory_space<vmem>>, vector<1x32xf32>
    %c1 = arith.constant 1 : index
    %c0_1 = arith.constant 0 : index
    %1 = vector.load %arg6[%c1, %c0_1] : memref<8x32xf32, #tpu.memory_space<vmem>>, vector<1x32xf32>
    %c2 = arith.constant 2 : index
    %c0_2 = arith.constant 0 : index
    %2 = vector.load %arg6[%c2, %c0_2] : memref<8x32xf32, #tpu.memory_space<vmem>>, vector<1x32xf32>
    %c3 = arith.constant 3 : index
    %c0_3 = arith.constant 0 : index
    %3 = vector.load %arg6[%c3, %c0_3] : memref<8x32xf32, #tpu.memory_space<vmem>>, vector<1x32xf32>
    %c4 = arith.constant 4 : index
    %c0_4 = arith.constant 0 : index
    %4 = vector.load %arg6[%c4, %c0_4] : memref<8x32xf32, #tpu.memory_space<vmem>>, vector<1x32xf32>
    %c0_5 = arith.constant 0 : index
    %c0_6 = arith.constant 0 : index
    %5 = vector.load %arg1[%c0_5, %c0_6] : memref<2x32xf32, #tpu.memory_space<vmem>>, vector<2x32xf32>
    %c0_7 = arith.constant 0 : index
    %c0_8 = arith.constant 0 : index
    %6 = vector.load %arg2[%c0_7, %c0_8] : memref<2x32xf32, #tpu.memory_space<vmem>>, vector<2x32xf32>
    %7 = vector.broadcast %0 : vector<1x32xf32> to vector<2x32xf32>
    %8 = arith.mulf %7, %6 : vector<2x32xf32>
    %9 = arith.addf %5, %8 : vector<2x32xf32>
    %c0_9 = arith.constant 0 : index
    %c0_10 = arith.constant 0 : index
    %c0_11 = arith.constant 0 : index
    %10 = vector.load %arg5[%c0_9, %c0_10, %c0_11] : memref<2x32x32xf32, #tpu.memory_space<vmem>>, vector<1x32x32xf32>
    %11 = vector.shape_cast %10 : vector<1x32x32xf32> to vector<32x32xf32>
    %cst = arith.constant dense<0.000000e+00> : vector<2x32xf32>
    %12 = tpu.matmul %9, %11, %cst {dimension_numbers = #tpu.dot_dimension_numbers<[1], [0], [0], [1], [0, 0, 1, 1], [], []>} : vector<2x32xf32>, vector<32x32xf32>, vector<2x32xf32> -> vector<2x32xf32>
    %13 = vector.broadcast %1 : vector<1x32xf32> to vector<2x32xf32>
    %14 = arith.addf %12, %13 : vector<2x32xf32>
    %c0_12 = arith.constant 0 : index
    %c0_13 = arith.constant 0 : index
    %15 = vector.load %arg3[%c0_12, %c0_13] : memref<2x32xf32, #tpu.memory_space<vmem>>, vector<2x32xf32>
    %16 = vector.broadcast %2 : vector<1x32xf32> to vector<2x32xf32>
    %17 = arith.mulf %16, %15 : vector<2x32xf32>
    %18 = arith.addf %14, %17 : vector<2x32xf32>
    %19 = math.tanh %18 : vector<2x32xf32>
    %c1_14 = arith.constant 1 : index
    %c0_15 = arith.constant 0 : index
    %c0_16 = arith.constant 0 : index
    %20 = vector.load %arg5[%c1_14, %c0_15, %c0_16] : memref<2x32x32xf32, #tpu.memory_space<vmem>>, vector<1x32x32xf32>
    %21 = vector.shape_cast %20 : vector<1x32x32xf32> to vector<32x32xf32>
    %cst_17 = arith.constant dense<0.000000e+00> : vector<2x32xf32>
    %22 = tpu.matmul %19, %21, %cst_17 {dimension_numbers = #tpu.dot_dimension_numbers<[1], [0], [0], [1], [0, 0, 1, 1], [], []>} : vector<2x32xf32>, vector<32x32xf32>, vector<2x32xf32> -> vector<2x32xf32>
    %23 = vector.broadcast %3 : vector<1x32xf32> to vector<2x32xf32>
    %24 = arith.addf %22, %23 : vector<2x32xf32>
    %c0_18 = arith.constant 0 : index
    %c0_19 = arith.constant 0 : index
    %25 = vector.load %arg4[%c0_18, %c0_19] : memref<2x32xf32, #tpu.memory_space<vmem>>, vector<2x32xf32>
    %26 = vector.broadcast %4 : vector<1x32xf32> to vector<2x32xf32>
    %27 = arith.mulf %26, %25 : vector<2x32xf32>
    %28 = arith.addf %24, %27 : vector<2x32xf32>
    %29 = math.tanh %28 : vector<2x32xf32>
    %c0_20 = arith.constant 0 : index
    %c0_21 = arith.constant 0 : index
    %30 = vector.load %arg7[%c0_20, %c0_21] : memref<2x32xf32, #tpu.memory_space<vmem>>, vector<2x32xf32>
    tpu.vector_store %arg7[%c0_20, %c0_21], %29 {strides = array<i32>} : memref<2x32xf32, #tpu.memory_space<vmem>>, vector<2x32xf32>,
    return
  }
  func.func @transform_0(%arg0: i32) -> (i32, i32) {
    %c0_i32 = arith.constant 0 : i32
    %c0_i32_0 = arith.constant 0 : i32
    return %arg0, %c0_i32 : i32, i32
  }
  func.func @transform_1(%arg0: i32) -> (i32, i32) {
    %c0_i32 = arith.constant 0 : i32
    %c0_i32_0 = arith.constant 0 : i32
    return %arg0, %c0_i32 : i32, i32
  }
  func.func @transform_2(%arg0: i32) -> (i32, i32) {
    %c0_i32 = arith.constant 0 : i32
    %c0_i32_0 = arith.constant 0 : i32
    return %arg0, %c0_i32 : i32, i32
  }
  func.func @transform_3(%arg0: i32) -> (i32, i32) {
    %c0_i32 = arith.constant 0 : i32
    %c0_i32_0 = arith.constant 0 : i32
    return %arg0, %c0_i32 : i32, i32
  }
  func.func @transform_4(%arg0: i32) -> (i32, i32, i32) {
    %c0_i32 = arith.constant 0 : i32
    %c0_i32_0 = arith.constant 0 : i32
    %c0_i32_1 = arith.constant 0 : i32
    %c0_i32_2 = arith.constant 0 : i32
    return %c0_i32, %c0_i32_0, %c0_i32_1 : i32, i32, i32
  }
  func.func @transform_5(%arg0: i32) -> (i32, i32) {
    %c0_i32 = arith.constant 0 : i32
    %c0_i32_0 = arith.constant 0 : i32
    %c0_i32_1 = arith.constant 0 : i32
    return %c0_i32, %c0_i32_0 : i32, i32
  }
  func.func @transform_6(%arg0: i32) -> (i32, i32) {
    %c0_i32 = arith.constant 0 : i32
    %c0_i32_0 = arith.constant 0 : i32
    return %arg0, %c0_i32 : i32, i32
  }
}

</mosaic_0001>

<bundles_post_ra>
// kernel: tpu_custom_call.1
= control target key start
LH: loop header
LB: loop body
LE: loop exit
PB: predicated region body
PF: predicated region fallthrough
CT: control target
= control target key end

     0   :  { %11 = vsyncpa [#allocation3], 0  ;;  %s508_s0 = inlined_call_operand.hbm [shape: f32[2,32], index: 0, kind: input, shape index: {}]   ;;  %s509_s1 = inlined_call_operand.vmem [shape: f32[2,32], index: 1, kind: input, shape index: {}]   ;;  %s510_s2 = inlined_call_operand.vmem [shape: f32[2,32], index: 2, kind: input, shape index: {}]   ;;  %s511_s3 = inlined_call_operand.vmem [shape: f32[2,32], index: 3, kind: input, shape index: {}]   ;;  %s512_s4 = inlined_call_operand.hbm [shape: f32[2,32,32], index: 4, kind: input, shape index: {}]   ;;  %s513_s5 = inlined_call_operand.vmem [shape: f32[8,32], index: 5, kind: input, shape index: {}]   ;;  %s514_s6 = inlined_call_operand.hbm [shape: f32[2,32], index: 6, kind: output, shape index: {}]  }
   0x1   :  { %12 = vsyncpa [#allocation6], 0 }
   0x2   :  { %13 = vsyncpa [#allocation4], 0  ;;  %s396_s21 = smov [#allocation2]   ;;  %s397_s23 = smov [#allocation5]  }
   0x3   :  { %s20_s22 = sshll.u32 %s396_s21, 4  ;;  %s35_s24 = sshll.u32 %s397_s23, 4  ;;  %s21_s22 = int_to_ptr.vmem [resolvable:$true] %s20_s22  ;;  %s439_s24 = int_to_ptr.vmem [resolvable:$true] %s35_s24 }
   0x4   :  { %s324_s27 = scalar_lea.hbm %s508_s0, 32 }
   0x5   :  { %p325_p0 = scmp.ne.s32.totalorder %s508_s0, %s324_s27  ;;  %p328_p1 = scmp.lt.u32.totalorder %s324_s27, %s508_s0 }
   0x7   :  { %p330_p2 = pnand %p328_p1, %p325_p0 }
   0x9   :  { %333 = shalt.err (!%p330_p2)
}
   0xa   :  { %s334_s8 = scalar_lea.vmem %s21_s22, 32  ;;  %p339_p4 = scmp.lt.s32.totalorder %s21_s22, %s21_s22 }
   0xb   :  { %p335_p3 = scmp.ne.s32.totalorder %s21_s22, %s334_s8  ;;  %p340_p5 = scmp.lt.s32.totalorder %s334_s8, %s334_s8 }
   0xd   :  { %p341_p6 = por %p340_p5, %p339_p4 }
   0xf   :  { %p342_p7 = pnand %p341_p6, %p335_p3 }
  0x11   :  { %345 = shalt.err (!%p342_p7)
}
  0x12   :  { %23 = dma.hbm_to_vmem [thread:$0]  %s508_s0, 32, %s21_s22, [#allocation3]  }
  0x13   :  { %s346_s13 = scalar_lea.hbm %s512_s4, 1024 }
  0x14   :  { %p347_p8 = scmp.ne.s32.totalorder %s512_s4, %s346_s13  ;;  %p350_p9 = scmp.lt.u32.totalorder %s346_s13, %s512_s4 }
  0x16   :  { %p352_p10 = pnand %p350_p9, %p347_p8 }
  0x18   :  { %355 = shalt.err (!%p352_p10)
}
  0x19   :  { %s356_s18 = scalar_lea.vmem %s439_s24, 1024  ;;  %p361_p12 = scmp.lt.s32.totalorder %s439_s24, %s439_s24 }
  0x1a   :  { %p357_p11 = scmp.ne.s32.totalorder %s439_s24, %s356_s18  ;;  %p362_p13 = scmp.lt.s32.totalorder %s356_s18, %s356_s18 }
  0x1c   :  { %p363_p0 = por %p362_p13, %p361_p12 }
  0x1e   :  { %p364_p1 = pnand %p363_p0, %p357_p11 }
  0x20   :  { %367 = shalt.err (!%p364_p1)
}
  0x21   :  { %s398_s0 = smov 128   ;;  %s399_s19 = smov 8  }
  0x22   :  { %41 = dma.hbm_to_vmem [thread:$0]  %s512_s4, 1024, %s439_s24, [#allocation6], %s398_s0, %s398_s0, %s399_s19  }
  0x23   :  { %390 = dma.done.wait [#allocation3], 32  }
  0x24   :  { %391 = vsyncadd [#allocation3], 4294967264 }
  0x25   :  { %392 = dma.done.wait [#allocation6], 1024  }
  0x26   :  { %393 = vsyncadd [#allocation6], 4294966272  ;;  %v400_v0 = vmov 0.0|0.0   ;;  %vm401_vm0 = vmmov 0   ;;  %v402_v1 = vmov 0.0   ;;  %v63_v2 = vld [vmem:[#allocation5] sm:$0xff] }
  0x27   :  { %300 = vmatprep.subr.bf16.mxu0 %v400_v0  ;;  %286 = vmatprep.mubr.msk.f32.mxu0 %vm401_vm0, %v402_v1  ;;  %v64_v3 = vld [vmem:[#allocation5 + $0x8] sm:$0xff]  ;;  %v65_v4 = vld [vmem:[#allocation5 + $0x10] sm:$0xff]  ;;  %v66_v6 = vld [vmem:[#allocation5 + $0x18] sm:$0xff]  ;;  %vm71_vm1 = vcmask 261120   ;;  %s403_s11 = smov [#allocation7]   ;;  %vm243_vm2 = vcmask 254976  }
  0x28   :  { %306 = vmatprep.subr.bf16.mxu1 %v400_v0  ;;  %297 = vmatprep.mubr.msk.f32.mxu1 %vm401_vm0, %v402_v1  ;;  %v301_v5 = vpack.c.bf16 %v64_v3, %v63_v2  ;;  %v261_v7 = vld [vmem:[%s513_s5] ss:$0 sm:$0xff]  ;;  %v304_v9 = vpack.c.bf16 %v66_v6, %v65_v4  ;;  %v55_v10 = vld [vmem:[#allocation2] sm:$0x3]  ;;  %v154_v13 = vld [vmem:[#allocation5 + $0x20] sm:$0xff]  ;;  %s251_s12 = sshll.u32 %s403_s11, 4  ;;  %s252_s12 = int_to_ptr.vmem [resolvable:$true] %s251_s12 }
  0x29   :  { %v56_v8 = vld [vmem:[%s509_s1] sm:$0x3]  ;;  %v155_v14 = vld [vmem:[#allocation5 + $0x28] sm:$0xff]  ;;  %v157_v17 = vld [vmem:[#allocation5 + $0x38] sm:$0xff]  ;;  %s368_s13 = scalar_lea.vmem %s252_s12, 32  ;;  %p373_p3 = scmp.lt.s32.totalorder %s252_s12, %s252_s12 }
  0x2a   :  { %302 = vmatpush3.bf16.msra.mxu0 %v301_v5  ;;  %v61_v11 = vmul.f32 %v261_v7, %v56_v8  ;;  %v156_v15 = vld [vmem:[#allocation5 + $0x30] sm:$0xff]  ;;  %v307_v16 = vpack.c.bf16 %v155_v14, %v154_v13  ;;  %v264_v19 = vld [vmem:[%s513_s5 + $0x2] ss:$0 sm:$0xff]  ;;  %v267_v28 = vld [vmem:[%s513_s5 + $0x4] ss:$0 sm:$0xff]  ;;  %p369_p2 = scmp.ne.s32.totalorder %s252_s12, %s368_s13  ;;  %p374_p4 = scmp.lt.s32.totalorder %s368_s13, %s368_s13 }
  0x2b   :  { %303 = vmatprep.subr.bf16.mxu0 %v400_v0  ;;  %v310_v18 = vpack.c.bf16 %v157_v17, %v156_v15  ;;  %v145_v20 = vld [vmem:[%s510_s2] sm:$0x3]  ;;  %v265_v30 = vld [vmem:[%s513_s5 + $0x3] ss:$0 sm:$0xff] }
  0x2c   :  { %v62_v12 = vadd.f32 %v61_v11, %v55_v10  ;;  %308 = vmatpush3.bf16.msra.mxu1 %v307_v16  ;;  %v262_v21 = vld [vmem:[%s513_s5 + $0x1] ss:$0 sm:$0xff]  ;;  %v150_v22 = vmul.f32 %v264_v19, %v145_v20  ;;  %p375_p5 = por %p374_p4, %p373_p3 }
  0x2d   :  { %309 = vmatprep.subr.bf16.mxu1 %v400_v0  ;;  %v235_v29 = vld [vmem:[%s511_s3] sm:$0x3] }
  0x2e   :  { %305 = vmatpush3.bf16.msra.mxu0 %v304_v9  ;;  %v240_v31 = vmul.f32 %v267_v28, %v235_v29  ;;  %p376_p6 = pnand %p375_p5, %p369_p2 }
  0x30   :  { %311 = vmatpush3.bf16.msra.mxu1 %v310_v18 }
  0x31   :  { %287 = vmatmul.mubr.msk.f32.vlgmr.msra.gmra.mrb[0].mxu0 %vm71_vm1, %v62_v12 }
 0x104   :  { %v141_v23 = vpop.f32.mrb[0].mxu0 }
 0x105   :  { %v142_v24 = vadd.f32 %v262_v21, %v141_v23  ;;  %v288_v25 = vpop.f32.mrb[1].mxu0 }
 0x107   :  { %v151_v26 = vadd.f32 %v150_v22, %v142_v24 }
 0x109   :  { %320 = vtanh.f32 %v151_v26 }
 0x113   :  { %v321_v27 = vpop.eup %320 }
 0x114   :  { %298 = vmatmul.mubr.msk.f32.vlgmr.msra.gmra.mrb[0].mxu1 %vm71_vm1, %v321_v27 }
 0x1e7   :  { %v231_v32 = vpop.f32.mrb[0].mxu1 }
 0x1e8   :  { %v232_v33 = vadd.f32 %v265_v30, %v231_v32  ;;  %v299_v34 = vpop.f32.mrb[1].mxu1 }
 0x1ea   :  { %v241_v35 = vadd.f32 %v240_v31, %v232_v33 }
 0x1ec   :  { %322 = vtanh.f32 %v241_v35 }
 0x1f6   :  { %v323_v36 = vpop.eup %322 }
 0x1f7   :  { %244 = vst.msk [vmem:[#allocation7] sm:$0x3] %vm243_vm2, %v323_v36 }
 0x1f8   :  { %379 = shalt.err (!%p376_p6)
}
 0x1f9   :  { %s380_s14 = scalar_lea.hbm %s514_s6, 32 }
 0x1fa   :  { %p381_p7 = scmp.ne.s32.totalorder %s514_s6, %s380_s14  ;;  %p384_p8 = scmp.lt.u32.totalorder %s380_s14, %s514_s6 }
 0x1fc   :  { %p386_p9 = pnand %p384_p8, %p381_p7 }
 0x1fe   :  { %389 = shalt.err (!%p386_p9)
}
 0x1ff   :  { %254 = dma.vmem_to_hbm [thread:$0]  %s252_s12, 32, %s514_s6, [#allocation4]  }
 0x200   :  { %394 = dma.done.wait [#allocation4], 32  }
 0x201   :  { %395 = vsyncadd [#allocation4], 4294967264 }
 0x202   :  { %258 = vsyncpa [#allocation3], 1 }
 0x203   :  { %259 = vsyncpa [#allocation6], 1 }
 0x204   :  { %260 = vsyncpa [#allocation4], 1 }

</bundles_post_ra>
